<compile_context>
chip_gen: v7x
topology: tpu7x:2x2x1
jax: 0.10.0
libtpu: 0.0.40
codegen_flags: <defaults>
</compile_context>

<pallas_src>
import math

import jax
import jax.numpy as jnp
from jax.experimental import pallas as pl
from jax.experimental.pallas import tpu as pltpu


def _residual_kernel(w_ref, x_ref, px_ref, o_ref):
    # w_ref : (1, tile_hw)        -- broadcast over rows
    # x_ref : (tile_m, tile_hw)
    # px_ref: (tile_m, tile_hw)
    # o_ref : (tile_m, tile_hw)
    cdt = o_ref.dtype
    w = jnp.clip(w_ref[...], 0, 1).astype(cdt)
    x = x_ref[...].astype(cdt)
    px = px_ref[...].astype(cdt)
    # out = w*px + (1-w)*x  ==  x + w*(px - x)
    o_ref[...] = x + w * (px - x)


def _sublane_unit(dtype):
    """Min sublane multiple for a non-full block: 8 f32, 16 bf16, 32 int8/fp8."""
    itemsize = jnp.dtype(dtype).itemsize
    return max(8, 32 // max(1, itemsize))


def _pick_tile(dim, unit, cap):
    """Largest divisor of `dim` that is a multiple of `unit` and <= cap.

    Caller guarantees dim % unit == 0, so at least `unit` is returned."""
    best = unit
    limit = min(dim, (cap // unit) * unit)
    t = unit
    while t <= limit:
        if dim % t == 0:
            best = t
        t += unit
    return best


_ROW_CAP = 256    # sublane-tile cap (rows per block)
_LANE_CAP = 2048  # lane-tile cap   (elements per row per block)


def residual(x, prev_x, weights):
    """x, prev_x: (..., H, W); weights: (H, W).

    Returns clamp(weights, 0, 1) * prev_x + (1 - clamp(weights, 0, 1)) * x,
    matching Residual.forward (the in-place parameter clamp of the PyTorch
    module is folded into the forward compute).
    """
    assert weights.ndim == 2
    assert x.shape[-2:] == weights.shape and prev_x.shape == x.shape
    H, W = weights.shape
    HW = H * W

    lead = x.shape[:-2]
    M = 1
    for d in lead:
        M *= d

    out_dtype = jnp.result_type(x.dtype, prev_x.dtype, weights.dtype)
    sub_unit = _sublane_unit(out_dtype)

    # Free row-major reinterpretations -- no transposes, no extra HBM traffic.
    x2 = x.reshape(M, HW)
    p2 = prev_x.reshape(M, HW)
    w2 = weights.reshape(1, HW)

    # ---- Lane packing: make the lane axis a multiple of 128 for free --------
    k = 1
    if HW % 128 != 0:
        need = 128 // math.gcd(HW, 128)
        if need > 1 and M % need == 0:
            k = need
    if k > 1:
        Mp, HWp = M // k, HW * k
        x2 = x2.reshape(Mp, HWp)
        p2 = p2.reshape(Mp, HWp)
        w2 = jnp.tile(w2, (1, k))          # tiny; wrapper-side cost is negligible
    else:
        Mp, HWp = M, HW

    # ---- Alignment: pad only when the dim is too big for a full-dim block ---
    pad_rows = (-Mp) % sub_unit if (Mp % sub_unit != 0 and Mp > _ROW_CAP) else 0
    pad_lanes = (-HWp) % 128 if (HWp % 128 != 0 and HWp > _LANE_CAP) else 0
    if pad_rows or pad_lanes:
        x2 = jnp.pad(x2, ((0, pad_rows), (0, pad_lanes)))
        p2 = jnp.pad(p2, ((0, pad_rows), (0, pad_lanes)))
        if pad_lanes:
            w2 = jnp.pad(w2, ((0, 0), (0, pad_lanes)))
    M_pad, HW_pad = Mp + pad_rows, HWp + pad_lanes

    # ---- Tile selection (dtype-aware sublane unit, bounded block bytes) -----
    if M_pad % sub_unit == 0:
        tile_m = _pick_tile(M_pad, sub_unit, _ROW_CAP)
    else:
        tile_m = M_pad                      # small unaligned dim: full-dim block
    if HW_pad % 128 == 0:
        tile_hw = _pick_tile(HW_pad, 128, _LANE_CAP)
    else:
        tile_hw = HW_pad                    # small unaligned dim: full-dim block

    n_j = HW_pad // tile_hw                 # lane-tile steps (outer axis)
    n_i = M_pad // tile_m                   # row-tile steps  (inner axis)

    # v7x megacore: make sure at least one parallel axis has >= 2 steps.
    if n_j * n_i == 1:
        if tile_hw % 256 == 0:
            tile_hw //= 2
            n_j = 2
        elif tile_m % (2 * sub_unit) == 0:
            tile_m //= 2
            n_i = 2

    grid = (n_j, n_i)

    # Advisory cost model for XLA scheduling around the custom call.
    elems = M * HW
    bytes_accessed = (elems * (x.dtype.itemsize + prev_x.dtype.itemsize)
                      + HW * weights.dtype.itemsize
                      + elems * jnp.dtype(out_dtype).itemsize)
    cost = pl.CostEstimate(flops=3 * elems, transcendentals=0,
                           bytes_accessed=bytes_accessed)

    out_mat = pl.pallas_call(
        _residual_kernel,
        out_shape=jax.ShapeDtypeStruct((M_pad, HW_pad), out_dtype),
        grid_spec=pltpu.PrefetchScalarGridSpec(
            num_scalar_prefetch=0,
            grid=grid,
            in_specs=[
                # weights: block index depends only on j (outer axis) -> the
                # tile stays resident across all inner-axis steps.
                pl.BlockSpec((1, tile_hw), lambda j, i: (0, j)),
                pl.BlockSpec((tile_m, tile_hw), lambda j, i: (i, j)),
                pl.BlockSpec((tile_m, tile_hw), lambda j, i: (i, j)),
            ],
            out_specs=pl.BlockSpec((tile_m, tile_hw), lambda j, i: (i, j)),
        ),
        compiler_params=pltpu.CompilerParams(
            dimension_semantics=("parallel", "parallel"),
            vmem_limit_bytes=48 << 20),
        cost_estimate=cost,
    )(w2, x2, p2)

    if pad_rows or pad_lanes:
        out_mat = out_mat[:Mp, :HWp]
    return out_mat.reshape(x.shape)


def _reference(x, prev_x, weights):
    w_c = jnp.clip(weights, 0.0, 1.0)
    bshape = (1,) * (x.ndim - 2) + weights.shape
    w_c = w_c.reshape(bshape)
    return w_c * prev_x + (1.0 - w_c) * x


if __name__ == "__main__":
    key = jax.random.PRNGKey(0)
    k_x, k_p, k_w, k_x2, k_p2, k_w2 = jax.random.split(key, 6)

    # Small shapes consistent with the module: batch=2, channels=4, spatial=16.
    N, C, H, W = 2, 4, 16, 16
    x = jax.random.normal(k_x, (N, C, H, W), dtype=jnp.float32)
    prev_x = jax.random.normal(k_p, (N, C, H, W), dtype=jnp.float32)
    # Scale so some weights fall outside [0, 1] and the clamp is exercised.
    weights = jax.random.normal(k_w, (H, W), dtype=jnp.float32) * 2.0

    out = jax.block_until_ready(residual(x, prev_x, weights))
    ref = _reference(x, prev_x, weights)
    assert out.shape == x.shape and out.dtype == ref.dtype
    assert jnp.allclose(out, ref, atol=1e-6, rtol=1e-6)

    # Second case exercises the lane-packing path (H*W = 96, not a multiple of
    # 128 -> 4 rows packed into the lane axis).
    H2, W2 = 8, 12
    x_b = jax.random.normal(k_x2, (N, C, H2, W2), dtype=jnp.float32)
    p_b = jax.random.normal(k_p2, (N, C, H2, W2), dtype=jnp.float32)
    w_b = jax.random.normal(k_w2, (H2, W2), dtype=jnp.float32) * 2.0
    out_b = jax.block_until_ready(residual(x_b, p_b, w_b))
    ref_b = _reference(x_b, p_b, w_b)
    assert jnp.allclose(out_b, ref_b, atol=1e-6, rtol=1e-6)

    # TODO(synk): the in-place nn.Parameter mutation (self.weights.data = clamp)
    # is a training-time side effect with no forward-output consequence; the
    # clamp is applied functionally inside the kernel instead.
    print("KERNEL_OK")
</pallas_src>

<mosaic_0001>
module attributes {stable_mosaic.version = 11 : i64} {
  func.func @_residual_kernel(%arg0: i32, %arg1: i32, %arg2: memref<1x128xf32, #tpu.memory_space<vmem>>, %arg3: memref<8x128xf32, #tpu.memory_space<vmem>>, %arg4: memref<8x128xf32, #tpu.memory_space<vmem>>, %arg5: memref<8x128xf32, #tpu.memory_space<vmem>>) attributes {dimension_semantics = [#tpu.dimension_semantics<parallel>, #tpu.dimension_semantics<parallel>], iteration_bounds = array<i64: 2, 1>, scalar_prefetch = 0 : i64, scratch_operands = 0 : i64, tpu.core_type = #tpu.core_type<tc>, window_params = [{transform_indices = @transform_0, window_bounds = array<i64: 1, 128>}, {transform_indices = @transform_1, window_bounds = array<i64: 8, 128>}, {transform_indices = @transform_2, window_bounds = array<i64: 8, 128>}, {transform_indices = @transform_3, window_bounds = array<i64: 8, 128>}]} {
    %c0 = arith.constant 0 : index
    %c0_0 = arith.constant 0 : index
    %0 = vector.load %arg2[%c0, %c0_0] : memref<1x128xf32, #tpu.memory_space<vmem>>, vector<1x128xf32>
    %c0_i32 = arith.constant 0 : i32
    %c1_i32 = arith.constant 1 : i32
    %1 = arith.sitofp %c0_i32 : i32 to f32
    %2 = vector.broadcast %1 : f32 to vector<1x128xf32>
    %3 = arith.maximumf %2, %0 : vector<1x128xf32>
    %4 = arith.sitofp %c1_i32 : i32 to f32
    %5 = vector.broadcast %4 : f32 to vector<1x128xf32>
    %6 = arith.minimumf %5, %3 : vector<1x128xf32>
    %c0_1 = arith.constant 0 : index
    %c0_2 = arith.constant 0 : index
    %7 = vector.load %arg3[%c0_1, %c0_2] : memref<8x128xf32, #tpu.memory_space<vmem>>, vector<8x128xf32>
    %c0_3 = arith.constant 0 : index
    %c0_4 = arith.constant 0 : index
    %8 = vector.load %arg4[%c0_3, %c0_4] : memref<8x128xf32, #tpu.memory_space<vmem>>, vector<8x128xf32>
    %9 = arith.subf %8, %7 : vector<8x128xf32>
    %10 = vector.broadcast %6 : vector<1x128xf32> to vector<8x128xf32>
    %11 = arith.mulf %10, %9 : vector<8x128xf32>
    %12 = arith.addf %7, %11 : vector<8x128xf32>
    %c0_5 = arith.constant 0 : index
    %c0_6 = arith.constant 0 : index
    %13 = vector.load %arg5[%c0_5, %c0_6] : memref<8x128xf32, #tpu.memory_space<vmem>>, vector<8x128xf32>
    tpu.vector_store %arg5[%c0_5, %c0_6], %12 {strides = array<i32>} : memref<8x128xf32, #tpu.memory_space<vmem>>, vector<8x128xf32>,
    return
  }
  func.func @transform_0(%arg0: i32, %arg1: i32) -> (i32, i32) {
    %c0_i32 = arith.constant 0 : i32
    %c0_i32_0 = arith.constant 0 : i32
    return %c0_i32, %arg0 : i32, i32
  }
  func.func @transform_1(%arg0: i32, %arg1: i32) -> (i32, i32) {
    %c0_i32 = arith.constant 0 : i32
    return %arg1, %arg0 : i32, i32
  }
  func.func @transform_2(%arg0: i32, %arg1: i32) -> (i32, i32) {
    %c0_i32 = arith.constant 0 : i32
    return %arg1, %arg0 : i32, i32
  }
  func.func @transform_3(%arg0: i32, %arg1: i32) -> (i32, i32) {
    %c0_i32 = arith.constant 0 : i32
    return %arg1, %arg0 : i32, i32
  }
}

</mosaic_0001>

<bundles_post_ra>
// kernel: tpu_custom_call.1
= control target key start
LH: loop header
LB: loop body
LE: loop exit
PB: predicated region body
PF: predicated region fallthrough
CT: control target
= control target key end

     0   :  { %s978_s0 = inlined_call_operand.hbm [shape: f32[1,256], index: 0, kind: input, shape index: {}]   ;;  %s979_s1 = inlined_call_operand.hbm [shape: f32[8,256], index: 1, kind: input, shape index: {}]   ;;  %s980_s2 = inlined_call_operand.hbm [shape: f32[8,256], index: 2, kind: input, shape index: {}]   ;;  %s981_s3 = inlined_call_operand.hbm [shape: f32[8,256], index: 3, kind: output, shape index: {}]  }
   0x1   :  { %988 = sst [smem:[#allocation15_spill]] %s979_s1 }
   0x2   :  { %8 = vsyncpa [#allocation3], 0 }
   0x3   :  { %10 = vsyncpa [#allocation3 + $0x1], 0 }
   0x4   :  { %11 = vsyncpa [#allocation6], 0 }
   0x5   :  { %13 = vsyncpa [#allocation6 + $0x1], 0 }
   0x6   :  { %14 = vsyncpa [#allocation4], 0 }
   0x7   :  { %16 = vsyncpa [#allocation4 + $0x1], 0  ;;  %s722_s12 = smov 0   ;;  %s724_s13 = smov 0  }
   0x8   :  { %s726_s14 = smov 0   ;;  %s728_s15 = smov 0  }
   0x9   :  { %s730_s16 = smov 0   ;;  %s732_s17 = smov 0  }
   0xa LB: > { %989 = sst [smem:[#allocation12_spill]] %s692_s16  ;;  %s753_s18 = sadd.s32 4294967295, %s696_s17   ;;  %s696_s17 = sphi %s732_s17, %s22_s17   ;;  %s692_s16 = sphi %s730_s16, %s1009_s16   ;;  %s688_s15 = sphi %s728_s15, %s1008_s15   ;;  %s684_s14 = sphi %s726_s14, %s1012_s14   ;;  %s680_s13 = sphi %s724_s13, %s1011_s13   ;;  %s676_s12 = sphi %s722_s12, %s1010_s12  }
   0xb   : > { %s432_s19 = sadd.s32 4294967294, %s696_s17   ;;  %s34_s20 = sadd.s32 1, %s692_s16 }
   0xc   : > { %s41_s21 = sadd.s32 1, %s684_s14  ;;  %p36_p0 = scmp.ge.s32.totalorder %s34_s20, 2 }
   0xd   : > { %p48_p1 = scmp.ne.s32.totalorder %s684_s14, %s680_s13  ;;  %p49_p2 = scmp.eq.s32.totalorder %s696_s17, 0 }
   0xe   : > { %p54_p3 = scmp.ne.s32.totalorder %s680_s13, %s676_s12  ;;  %s1014_s20 = smov (%p36_p0, %s34_s20), 0 }
   0xf   : > { %990 = sst [smem:[#allocation13_spill]] %s1014_s20  ;;  %p765_p4 = por %p49_p2, %p48_p1 }
  0x10   : > { %p55_p5 = scmp.eq.s32.totalorder %s753_s18, 0  ;;  %s38_s23 = ssub.s32 %s692_s16, %s1014_s20 }
  0x11   : > { %p136_p6 = scmp.eq.s32.totalorder %s753_s18, 1  ;;  %p39_p7 = scmp.eq.s32.totalorder %s38_s23, 0 }
  0x12   : > { %p773_p8 = por %p55_p5, %p54_p3  ;;  %p142_p10 = scmp.eq.s32.totalorder %s432_s19, 1 }
  0x13   : > { %p777_p9 = por %p136_p6, %p48_p1  ;;  %p470_p13 = scmp.lt.s32.totalorder %s696_s17, 2 }
  0x14   : > { %s992_s24 = scalar_select %p773_p8, 1, 0 }
  0x15   : > { %s993_s25 = scalar_select %p777_p9, 1, 0 }
  0x16   : > { %s782_s26 = scalar_select %p39_p7, %s684_s14, %s41_s21  }
  0x17   : > { %p784_p11 = por %p142_p10, %p54_p3  ;;  %s791_s28 = sand.u32 1, %s684_s14  }
  0x18   : > { %994 = sst [smem:[#allocation14_spill]] %s782_s26  ;;  %s179_s29 = sand.u32 1, %s696_s17  }
  0x19   : > { %s995_s27 = scalar_select %p784_p11, 1, 0 }
  0x1a   : > { %s982_s30 = sshll.u32 %s791_s28, 3  ;;  %p797_p0 = pnand %p470_p13, %p765_p4 }
  0x1b   : > { %s437_s5 = sshll.u32 %s692_s16, 7  ;;  %s997_s1 = sld [smem:[#allocation15_spill]] }
  0x1c   : > { %s996_s4 = scalar_select %p797_p0, 1, 0 }
  0x1d   : > { %s183_s9 = scalar_lea.vmem [#allocation5], %s982_s30  ;;  %s814_s21 = scalar_lea.hbm %s980_s2, %s437_s5 }
  0x1e   : > { %s192_s10 = sshll.u32 %s183_s9, 4  ;;  %s816_s22 = scalar_lea.sflag [#allocation6], %s179_s29  ;;  %s809_s10 = int_to_ptr.vmem [resolvable:$true] %s192_s10 }
  0x1f   : > { %p822_p2 = pneg %p797_p0 }
  0x21   : > { %s805_s8 = scalar_lea.hbm %s997_s1, %s437_s5  ;;  %s525_s30 = scalar_lea.hbm %s997_s1, 256 }
  0x22   : > { %s520_s23 = scalar_lea.hbm %s805_s8, 128  ;;  %p526_p5 = scmp.lt.u32.totalorder %s805_s8, %s997_s1 }
  0x23   : > { %p521_p1 = scmp.ne.s32.totalorder %s805_s8, %s520_s23  ;;  %p527_p6 = scmp.lt.u32.totalorder %s525_s30, %s520_s23 }
  0x24   : > { %p529_p10 = scmp.lt.u32.totalorder %s520_s23, %s805_s8 }
  0x25   : > { %p523_p3 = pnand %p822_p2, %p521_p1  ;;  %p528_p7 = por %p527_p6, %p526_p5 }
  0x27   : > { %p524_p4 = pneg %p523_p3  ;;  %p530_p13 = por %p529_p10, %p528_p7 }
  0x29   : > { %p531_p12 = pnand %p530_p13, %p524_p4 }
  0x2b   : > { %534 = shalt.err (!%p531_p12)
}
  0x2c   : > { %s535_s29 = scalar_lea.vmem %s809_s10, 128  ;;  %s698_s19 = smov [#allocation5]  }
  0x2d   : > { %p536_p1 = scmp.ne.s32.totalorder %s809_s10, %s535_s29  ;;  %s540_s7 = sshll.u32 %s698_s19, 4  ;;  %s541_s7 = int_to_ptr.vmem [resolvable:$false] %s540_s7 }
  0x2e   : > { %s542_s9 = scalar_lea.vmem %s541_s7, 256  ;;  %p543_p9 = scmp.lt.s32.totalorder %s809_s10, %s541_s7 }
  0x2f   : > { %p538_p3 = pnand %p536_p1, %p822_p2  ;;  %p544_p8 = scmp.lt.s32.totalorder %s542_s9, %s535_s29 }
  0x31   : > { %p539_p11 = pneg %p538_p3  ;;  %p545_p5 = por %p544_p8, %p543_p9 }
  0x33   : > { %p546_p6 = pnand %p545_p5, %p539_p11 }
  0x35   : > { %549 = shalt.err (!%p546_p6)
}
  0x36   : > { %462 = dma.hbm_to_vmem [thread:$0]  (!%p797_p0), %s805_s8, 128, %s809_s10, %s816_s22  }
  0x37   : > { %p440_p12 = scmp.ge.s32.totalorder %s696_s17, 1  ;;  %p217_p4 = scmp.lt.s32.totalorder %s696_s17, 3 }
  0x38   : > { %s435_s23 = sshll.u32 %s692_s16, 4  ;;  %s165_s19 = scalar_lea.vmem [#allocation2], %s791_s28 }
  0x39   : > { %p848_p7 = pnand %p440_p12, %p217_p4  ;;  %s856_s29 = scalar_lea.hbm %s978_s0, %s435_s23 }
  0x3a   : > { %s172_s7 = sshll.u32 %s165_s19, 4  ;;  %s1000_s8 = sshll.u32 %s791_s28, 3  ;;  %s859_s7 = int_to_ptr.vmem [resolvable:$true] %s172_s7 }
  0x3b   : > { %s999_s30 = scalar_select %p848_p7, 1, 0 }
  0x3c   : > { %s863_s10 = scalar_lea.vmem [#allocation7], %s1000_s8  ;;  %s163_s1 = scalar_lea.sflag [#allocation3], %s791_s28 }
  0x3d   : > { %s212_s9 = sshll.u32 %s863_s10, 4  ;;  %s550_s20 = scalar_lea.hbm %s856_s29, 16  ;;  %s213_s9 = int_to_ptr.vmem [resolvable:$true] %s212_s9 }
  0x3e   : > { %p551_p8 = scmp.ne.s32.totalorder %s856_s29, %s550_s20  ;;  %s555_s5 = scalar_lea.hbm %s978_s0, 32 }
  0x3f   : > { %p556_p10 = scmp.lt.u32.totalorder %s856_s29, %s978_s0  ;;  %p557_p13 = scmp.lt.u32.totalorder %s555_s5, %s550_s20 }
  0x40   : > { %p553_p9 = pnand %p551_p8, %p822_p2  ;;  %p559_p3 = scmp.lt.u32.totalorder %s550_s20, %s856_s29 }
  0x41   : > { %p558_p1 = por %p557_p13, %p556_p10 }
  0x42   : > { %p554_p11 = pneg %p553_p9 }
  0x43   : > { %p560_p5 = por %p559_p3, %p558_p1 }
  0x45   : > { %p561_p6 = pnand %p560_p5, %p554_p11 }
  0x47   : > { %564 = shalt.err (!%p561_p6)
}
  0x48   : > { %s565_s28 = scalar_lea.vmem %s859_s7, 16  ;;  %s699_s19 = smov [#allocation2]  }
  0x49   : > { %p566_p12 = scmp.ne.s32.totalorder %s859_s7, %s565_s28  ;;  %s570_s8 = sshll.u32 %s699_s19, 4  ;;  %s571_s8 = int_to_ptr.vmem [resolvable:$false] %s570_s8 }
  0x4a   : > { %s572_s16 = scalar_lea.vmem %s571_s8, 32  ;;  %p573_p9 = scmp.lt.s32.totalorder %s859_s7, %s571_s8 }
  0x4b   : > { %p568_p4 = pnand %p566_p12, %p822_p2  ;;  %p574_p7 = scmp.lt.s32.totalorder %s572_s16, %s565_s28 }
  0x4d   : > { %p569_p8 = pneg %p568_p4  ;;  %p575_p10 = por %p574_p7, %p573_p9 }
  0x4f   : > { %p576_p13 = pnand %p575_p10, %p569_p8 }
  0x51   : > { %579 = shalt.err (!%p576_p13)
}
  0x52   : > { %459 = dma.hbm_to_vmem [thread:$0]  (!%p797_p0), %s856_s29, 16, %s859_s7, %s163_s1  }
  0x53   : > { %s580_s20 = scalar_lea.hbm %s814_s21, 128  ;;  %s585_s11 = scalar_lea.hbm %s980_s2, 256 }
  0x54   : > { %p581_p11 = scmp.ne.s32.totalorder %s814_s21, %s580_s20  ;;  %p586_p3 = scmp.lt.u32.totalorder %s814_s21, %s980_s2 }
  0x55   : > { %p587_p5 = scmp.lt.u32.totalorder %s585_s11, %s580_s20  ;;  %p589_p12 = scmp.lt.u32.totalorder %s580_s20, %s814_s21 }
  0x56   : > { %p583_p1 = pnand %p581_p11, %p822_p2 }
  0x57   : > { %p588_p6 = por %p587_p5, %p586_p3 }
  0x58   : > { %p584_p7 = pneg %p583_p1 }
  0x59   : > { %p590_p4 = por %p589_p12, %p588_p6 }
  0x5b   : > { %p591_p8 = pnand %p590_p4, %p584_p7 }
  0x5d   : > { %594 = shalt.err (!%p591_p8)
}
  0x5e   : > { %s595_s1 = scalar_lea.vmem %s213_s9, 128  ;;  %s700_s29 = smov [#allocation7]  }
  0x5f   : > { %p596_p9 = scmp.ne.s32.totalorder %s213_s9, %s595_s1  ;;  %s600_s7 = sshll.u32 %s700_s29, 4  ;;  %s601_s7 = int_to_ptr.vmem [resolvable:$false] %s600_s7 }
  0x60   : > { %s602_s10 = scalar_lea.vmem %s601_s7, 256  ;;  %p603_p11 = scmp.lt.s32.totalorder %s213_s9, %s601_s7 }
  0x61   : > { %p598_p10 = pnand %p596_p9, %p822_p2  ;;  %p604_p1 = scmp.lt.s32.totalorder %s602_s10, %s595_s1 }
  0x63   : > { %p599_p13 = pneg %p598_p10  ;;  %p605_p0 = por %p604_p1, %p603_p11 }
  0x65   : > { %p606_p3 = pnand %p605_p0, %p599_p13 }
  0x67   : > { %609 = shalt.err (!%p606_p3)
}
  0x68   : > { %p1001_p5 = scmp.ne.s32.totalorder %s996_s4, 0  ;;  %p1002_p7 = scmp.ne.s32.totalorder %s999_s30, 0 }
  0x69   : > { %s911_s6 = sand.u32 (!%p1002_p7), 1, %s680_s13   ;;  %p1003_p2 = scmp.ne.s32.totalorder (!%p1002_p7), %s992_s24, 0 }
  0x6a   : > { %465 = dma.hbm_to_vmem [thread:$0]  (!%p1001_p5), %s814_s21, 128, %s213_s9, %s816_s22  }
  0x6b   : > { %221 = sbr.rel (%p1002_p7) target bundleno = 144 (0x90), region = 32  ;;  %s224_s19 = scalar_lea.sflag (!%p1002_p7), [#allocation3], %s911_s6 }
  0x6c   : > { %s226_s8 = scalar_lea.vmem (!%p1002_p7), [#allocation2], %s911_s6 }
  0x72   : > { %663 = dma.done.wait (%p1003_p2), %s224_s19, 16  }
  0x73   : > { %665 = vsyncadd (%p1003_p2), %s224_s19, 4294967280  ;;  %s231_s4 = sand.u32 1, %s753_s18   ;;  %s441_s21 = sshll.u32 %s911_s6, 3 }
  0x74   : > { %s232_s22 = scalar_lea.sflag [#allocation6], %s231_s4  ;;  %s235_s30 = scalar_lea.vmem [#allocation5], %s441_s21 }
  0x75   : > { %667 = dma.done.wait (%p1003_p2), %s232_s22, 256  }
  0x76   : > { %669 = vsyncadd (%p1003_p2), %s232_s22, 4294967040  ;;  %v283_v0 = vlaneseq  ;;  %v276_v2 = vld [vmem:[%s226_s8] sm:$0x1]  ;;  %v279_v3 = vld [vmem:[%s235_s30] sm:$0xff]  ;;  %s244_s9 = scalar_lea.vmem [#allocation7], %s441_s21  ;;  %s275_s18 = scalar_lea.vmem [#allocation8], %s441_s21 }
  0x77   : > { %v280_v4 = vld [vmem:[%s244_s9] sm:$0xff]  ;;  %v277_v5 = vmax.f32 %v276_v2, 0.0  ;;  %s307_s16 = sshll.u32 %s275_s18, 4  ;;  %s445_s20 = sshll.u32 %s688_s15, 7  ;;  %s926_s16 = int_to_ptr.vmem [resolvable:$true] %s307_s16 }
  0x78   : > { %v284_v1 = vshrl.u32 %v283_v0, 7  ;;  %v281_v8 = vsub.f32 %v280_v4, %v279_v3  ;;  %s931_s23 = scalar_lea.hbm %s981_s3, %s445_s20  ;;  %s292_s11 = scalar_lea.sflag [#allocation4], %s911_s6 }
  0x79   : > { %v278_v7 = vmin.f32 %v277_v5, 1.0  ;;  %s610_s5 = scalar_lea.vmem %s926_s16, 128  ;;  %p1004_p6 = scmp.ne.s32.totalorder %s993_s25, 0 }
  0x7a   : > { %v285_v6 = vsub.s32 0, %v284_v1  ;;  %p611_p0 = scmp.ne.s32.totalorder %s926_s16, %s610_s5  ;;  %s701_s15 = smov [#allocation8]  }
  0x7b   : > { %s614_s28 = sshll.u32 %s701_s15, 4  ;;  %s615_s28 = int_to_ptr.vmem [resolvable:$false] %s614_s28 }
  0x7c   : > { %v286_v9 = vrot.slane %v278_v7, %v285_v6  ;;  %p612_p12 = pnand %p611_p0, %p1004_p6  ;;  %s616_s1 = scalar_lea.vmem %s615_s28, 256 }
  0x7d   : > { %p617_p8 = scmp.lt.s32.totalorder %s926_s16, %s615_s28  ;;  %p618_p9 = scmp.lt.s32.totalorder %s616_s1, %s610_s5 }
  0x7e   : > { %v288_v10 = vmul.f32 %v286_v9, %v281_v8  ;;  %p613_p4 = pneg %p612_p12 }
  0x7f   : > { %p619_p10 = por %p618_p9, %p617_p8 }
  0x80   : > { %v289_v11 = vadd.f32 %v288_v10, %v279_v3 }
  0x81   : > { %p620_p13 = pnand %p619_p10, %p613_p4 }
  0x82   : > { %290 = vst [vmem:[%s275_s18] sm:$0xff] %v289_v11 }
  0x83   : > { %623 = shalt.err (!%p620_p13)
}
  0x84   : > { %s624_s29 = scalar_lea.hbm %s931_s23, 128  ;;  %s628_s6 = scalar_lea.hbm %s981_s3, 256 }
  0x85   : > { %p625_p11 = scmp.ne.s32.totalorder %s931_s23, %s624_s29  ;;  %p629_p5 = scmp.lt.u32.totalorder %s931_s23, %s981_s3 }
  0x86   : > { %p630_p7 = scmp.lt.u32.totalorder %s628_s6, %s624_s29  ;;  %p632_p0 = scmp.lt.u32.totalorder %s624_s29, %s931_s23 }
  0x87   : > { %p626_p1 = pnand %p625_p11, %p1004_p6 }
  0x88   : > { %p631_p2 = por %p630_p7, %p629_p5 }
  0x89   : > { %p627_p3 = pneg %p626_p1 }
  0x8a   : > { %p633_p12 = por %p632_p0, %p631_p2 }
  0x8c   : > { %p634_p4 = pnand %p633_p12, %p627_p3 }
  0x8e   : > { %637 = shalt.err (!%p634_p4)
}
  0x8f   : > { %454 = dma.vmem_to_hbm [thread:$0]  (%p1004_p6), %s926_s16, 128, %s931_s23, %s292_s11  }
  0x90 PF: > { %s319_s4 = sand.u32 1, %s676_s12   ;;  %p1005_p8 = scmp.ne.s32.totalorder %s995_s27, 0 }
  0x91   : > { %p1006_p9 = scmp.ge.s32.totalorder %s696_s17, 2  ;;  %s320_s21 = scalar_lea.sflag [#allocation4], %s319_s4 }
  0x93   : > { %p467_p10 = pnand %p1006_p9, %p1005_p8 }
  0x95   : > { %671 = dma.done.wait (!%p467_p10), %s320_s21, 128  }
  0x96   : > { %673 = vsyncadd (!%p467_p10), %s320_s21, 4294967168  ;;  %s22_s17 = sadd.s32 1, %s696_s17   ;;  %s1007_s25 = sld [smem:[#allocation14_spill]] }
  0x97   : > { %p19_p13 = scmp.ge.s32.totalorder %s22_s17, 4   ;;  %s1008_s15 = sld [smem:[#allocation12_spill]] }
  0x98   : > { %s1009_s16 = sld [smem:[#allocation13_spill]]  ;;  %s1010_s12 = smov %s680_s13 }
  0x99   : > { %s1011_s13 = smov %s684_s14  ;;  %21 = sbr.rel (!%p19_p13) target bundleno = 10 (0xa), region = 101 }
  0x9c   : > { %s1012_s14 = smov %s1007_s25 }
  0xa0   :  { %325 = vsyncpa [#allocation3], 1 }
  0xa1   :  { %327 = vsyncpa [#allocation3 + $0x1], 1 }
  0xa2   :  { %328 = vsyncpa [#allocation6], 1 }
  0xa3   :  { %330 = vsyncpa [#allocation6 + $0x1], 1 }
  0xa4   :  { %331 = vsyncpa [#allocation4], 1 }
  0xa5   :  { %333 = vsyncpa [#allocation4 + $0x1], 1 }

</bundles_post_ra>
